<compile_context>
chip_gen: v7x
topology: tpu7x:2x2x1
jax: 0.10.0
libtpu: 0.0.40
codegen_flags: <defaults>
</compile_context>

<pallas_src>
import math
from functools import partial

import jax
import jax.numpy as jnp
from jax.experimental import pallas as pl
from jax.experimental.pallas import tpu as pltpu


def mhsa_kernel(x_ref, w_ref, b_ref, out_ref, *, seq_len, batch_block, scale):
    # x_ref:   (batch_block*S, D)    bf16  (same block reused for every head)
    # w_ref:   (D, 3*dh)             bf16  per-head fused [Wq_h | Wk_h | Wv_h]
    # b_ref:   (1, 3*dh)             f32   per-head fused bias
    # out_ref: (batch_block*S, dh)   x.dtype, one head's output slab
    dh = out_ref.shape[-1]
    inv_sqrt_scale = 1.0 / math.sqrt(scale)

    # Per-head fused QKV projection: one MXU matmul, bf16 operands, f32 acc.
    qkv = jnp.dot(x_ref[...], w_ref[...], preferred_element_type=jnp.float32)
    qkv = qkv + b_ref[...]                                  # (bb*S, 3*dh) f32

    # Static lane slices; fold 1/sqrt(scale) into Q once; cast matmul
    # operands to bf16 (accumulation stays f32).  The leading-dim reshape
    # (bb*S, dh) -> (bb, S, dh) leaves the lane dim untouched (free for
    # batch_block == 1; re-tiling only for bb > 1 with S a multiple of 8).
    q = ((qkv[:, 0 * dh:1 * dh] * inv_sqrt_scale)
         .astype(jnp.bfloat16).reshape(batch_block, seq_len, dh))
    k = qkv[:, 1 * dh:2 * dh].astype(jnp.bfloat16).reshape(batch_block, seq_len, dh)
    v = qkv[:, 2 * dh:3 * dh].astype(jnp.bfloat16).reshape(batch_block, seq_len, dh)

    # Scores: contract the last dim of both operands (MXU consumes K
    # transposed natively — no XLU transpose in the hot path).
    s = jnp.einsum('bqd,bkd->bqk', q, k,
                   preferred_element_type=jnp.float32)      # (bb, S, S) f32

    # Numerically stable softmax in f32; the divide goes to the EUP.
    m = jnp.max(s, axis=-1, keepdims=True)
    e = jnp.exp(s - m)
    l = jnp.sum(e, axis=-1, keepdims=True)
    p = (e * pl.reciprocal(l, approx=True)).astype(jnp.bfloat16)

    o = jnp.einsum('bqk,bkd->bqd', p, v,
                   preferred_element_type=jnp.float32)      # (bb, S, dh) f32

    out_ref[...] = o.reshape(batch_block * seq_len, dh).astype(out_ref.dtype)


def mhsa_pallas(x, wqkv, bqkv, *, n_heads, scale, batch_block=1):
    B, S, D = x.shape
    H = n_heads
    assert D % H == 0
    dh = D // H
    assert wqkv.shape == (D, 3 * D) and bqkv.shape == (3 * D,)
    assert B % batch_block == 0
    n_bb = B // batch_block
    rows = batch_block * S

    # Flatten rows and cast activations/weights to bf16 (halves DMA bytes,
    # bf16-native MXU); bias stays f32 (added after f32 accumulation).
    x2 = x.reshape(B * S, D).astype(jnp.bfloat16)

    # Head-major weight layout (done once, outside the kernel, by XLA):
    # (D, 3D) -> (H, D, 3*dh) where per head h the columns are [Q_h|K_h|V_h].
    w_heads = (wqkv.reshape(D, 3, H, dh).transpose(2, 0, 1, 3)
               .reshape(H, D, 3 * dh).astype(jnp.bfloat16))
    b_heads = (bqkv.reshape(3, H, dh).transpose(1, 0, 2)
               .reshape(H, 1, 3 * dh).astype(jnp.float32))

    kernel = partial(mhsa_kernel, seq_len=S, batch_block=batch_block,
                     scale=scale)

    out = pl.pallas_call(
        kernel,
        out_shape=jax.ShapeDtypeStruct((H, B * S, dh), x.dtype),
        grid_spec=pltpu.PrefetchScalarGridSpec(
            num_scalar_prefetch=0,
            # Batch outer, head inner (fastest): the x block index is
            # unchanged across the head axis, so it is fetched once per
            # batch block and reused for all heads.
            grid=(n_bb, H),
            in_specs=[
                pl.BlockSpec((rows, D), lambda i, h: (i, 0)),          # x rows
                pl.BlockSpec((None, D, 3 * dh), lambda i, h: (h, 0, 0)),  # W_h
                pl.BlockSpec((None, 1, 3 * dh), lambda i, h: (h, 0, 0)),  # b_h
            ],
            out_specs=pl.BlockSpec((None, rows, dh), lambda i, h: (h, i, 0)),
        ),
        compiler_params=pltpu.CompilerParams(
            dimension_semantics=("parallel", "parallel"),
            vmem_limit_bytes=32 * 1024 * 1024,
        ),
    )(x2, w_heads, b_heads)

    # (H, B*S, dh) -> (B, S, H*dh): head h occupies columns [h*dh:(h+1)*dh],
    # matching the PyTorch transpose(1,2).reshape(B, S, -1).  Plain XLA ops
    # outside the kernel.
    return out.reshape(H, B, S, dh).transpose(1, 2, 0, 3).reshape(B, S, D)


def mhsa_reference(x, wqkv, bqkv, *, n_heads, scale):
    # Pure-JAX reference matching the PyTorch module semantics, mirroring the
    # kernel's casting (bf16 matmul operands, f32 accumulation, f32 softmax).
    B, S, D = x.shape
    dh = D // n_heads
    xc = x.astype(jnp.bfloat16)
    wc = wqkv.astype(jnp.bfloat16)
    qkv = jnp.einsum('bsd,de->bse', xc, wc,
                     preferred_element_type=jnp.float32) + bqkv.astype(jnp.float32)
    q, k, v = qkv[..., :D], qkv[..., D:2 * D], qkv[..., 2 * D:]

    def split(t):  # (B, S, D) -> (B, H, S, dh)
        return t.reshape(B, S, n_heads, dh).transpose(0, 2, 1, 3)

    q, k, v = split(q), split(k), split(v)
    s = jnp.einsum('bhqd,bhkd->bhqk',
                   q.astype(jnp.bfloat16), k.astype(jnp.bfloat16),
                   preferred_element_type=jnp.float32) / jnp.sqrt(jnp.float32(scale))
    p = jax.nn.softmax(s, axis=-1)
    o = jnp.einsum('bhqk,bhkd->bhqd',
                   p.astype(jnp.bfloat16), v.astype(jnp.bfloat16),
                   preferred_element_type=jnp.float32)
    return o.transpose(0, 2, 1, 3).reshape(B, S, D).astype(x.dtype)


if __name__ == "__main__":
    # Small shapes consistent with the module: dim=32, heads=4, seq=8, batch=2.
    B, S, D, H = 2, 8, 32, 4
    att_scale = 'per_head'              # scale = D // H  (documented choice)
    scale = D if att_scale != 'per_head' else D // H

    key = jax.random.PRNGKey(0)
    keys = jax.random.split(key, 7)
    x = jax.random.normal(keys[0], (B, S, D), dtype=jnp.float32)

    # nn.Linear(dim, dim) weights are (out, in); pre-transposed to (in, out).
    wq = jax.random.normal(keys[1], (D, D), dtype=jnp.float32) * 0.05
    wk = jax.random.normal(keys[2], (D, D), dtype=jnp.float32) * 0.05
    wv = jax.random.normal(keys[3], (D, D), dtype=jnp.float32) * 0.05
    bq = jax.random.normal(keys[4], (D,), dtype=jnp.float32) * 0.05
    bk = jax.random.normal(keys[5], (D,), dtype=jnp.float32) * 0.05
    bv = jax.random.normal(keys[6], (D,), dtype=jnp.float32) * 0.05

    # Fuse the three projections into one (D, 3D) weight / (3D,) bias.
    wqkv = jnp.concatenate([wq, wk, wv], axis=1)
    bqkv = jnp.concatenate([bq, bk, bv], axis=0)

    out = mhsa_pallas(x, wqkv, bqkv, n_heads=H, scale=scale,
                      batch_block=max(1, B // 2))
    out = jax.block_until_ready(out)

    ref = mhsa_reference(x, wqkv, bqkv, n_heads=H, scale=scale)
    assert out.shape == (B, S, D)
    # Tolerance relaxed vs. 1e-5: bf16 matmul operands + approx (EUP) reciprocal.
    assert jnp.allclose(out, ref, atol=2e-2, rtol=2e-2), "mismatch vs reference"

    print("KERNEL_OK")
</pallas_src>

<mosaic_0001>
module attributes {stable_mosaic.version = 11 : i64} {
  func.func @mhsa_kernel(%arg0: i32, %arg1: i32, %arg2: memref<8x32xbf16, #tpu.memory_space<vmem>>, %arg3: memref<1x32x24xbf16, #tpu.memory_space<vmem>>, %arg4: memref<1x1x24xf32, #tpu.memory_space<vmem>>, %arg5: memref<1x8x8xf32, #tpu.memory_space<vmem>>) attributes {dimension_semantics = [#tpu.dimension_semantics<parallel>, #tpu.dimension_semantics<parallel>], iteration_bounds = array<i64: 2, 4>, scalar_prefetch = 0 : i64, scratch_operands = 0 : i64, tpu.core_type = #tpu.core_type<tc>, window_params = [{transform_indices = @transform_0, window_bounds = array<i64: 8, 32>}, {transform_indices = @transform_1, window_bounds = array<i64: 1, 32, 24>}, {transform_indices = @transform_2, window_bounds = array<i64: 1, 1, 24>}, {transform_indices = @transform_3, window_bounds = array<i64: 1, 8, 8>}]} {
    %c0 = arith.constant 0 : index
    %c0_0 = arith.constant 0 : index
    %0 = vector.load %arg2[%c0, %c0_0] : memref<8x32xbf16, #tpu.memory_space<vmem>>, vector<8x32xbf16>
    %c0_1 = arith.constant 0 : index
    %c0_2 = arith.constant 0 : index
    %c0_3 = arith.constant 0 : index
    %1 = vector.load %arg3[%c0_1, %c0_2, %c0_3] : memref<1x32x24xbf16, #tpu.memory_space<vmem>>, vector<1x32x24xbf16>
    %2 = vector.shape_cast %1 : vector<1x32x24xbf16> to vector<32x24xbf16>
    %cst = arith.constant dense<0.000000e+00> : vector<8x24xf32>
    %3 = tpu.matmul %0, %2, %cst {dimension_numbers = #tpu.dot_dimension_numbers<[1], [0], [0], [1], [0, 0, 1, 1], [], []>} : vector<8x32xbf16>, vector<32x24xbf16>, vector<8x24xf32> -> vector<8x24xf32>
    %c0_4 = arith.constant 0 : index
    %c0_5 = arith.constant 0 : index
    %c0_6 = arith.constant 0 : index
    %4 = vector.load %arg4[%c0_4, %c0_5, %c0_6] : memref<1x1x24xf32, #tpu.memory_space<vmem>>, vector<1x1x24xf32>
    %5 = vector.shape_cast %4 : vector<1x1x24xf32> to vector<1x24xf32>
    %6 = vector.broadcast %5 : vector<1x24xf32> to vector<8x24xf32>
    %7 = arith.addf %3, %6 : vector<8x24xf32>
    %8 = vector.extract_strided_slice %7 {offsets = [0, 0], sizes = [8, 8], strides = [1, 1]} : vector<8x24xf32> to vector<8x8xf32>
    %cst_7 = arith.constant 0.353553385 : f32
    %9 = vector.broadcast %cst_7 : f32 to vector<8x8xf32>
    %10 = arith.mulf %8, %9 : vector<8x8xf32>
    %11 = arith.truncf %10 : vector<8x8xf32> to vector<8x8xbf16>
    %12 = vector.shape_cast %11 : vector<8x8xbf16> to vector<1x8x8xbf16>
    %13 = vector.extract_strided_slice %7 {offsets = [0, 8], sizes = [8, 8], strides = [1, 1]} : vector<8x24xf32> to vector<8x8xf32>
    %14 = arith.truncf %13 : vector<8x8xf32> to vector<8x8xbf16>
    %15 = vector.shape_cast %14 : vector<8x8xbf16> to vector<1x8x8xbf16>
    %16 = vector.extract_strided_slice %7 {offsets = [0, 16], sizes = [8, 8], strides = [1, 1]} : vector<8x24xf32> to vector<8x8xf32>
    %17 = arith.truncf %16 : vector<8x8xf32> to vector<8x8xbf16>
    %18 = vector.shape_cast %17 : vector<8x8xbf16> to vector<1x8x8xbf16>
    "tpu.trace_start"() <{level = 10 : i32, message = "bqd,bkd->bqk"}> : () -> ()
    %cst_8 = arith.constant dense<0.000000e+00> : vector<1x8x8xf32>
    %19 = tpu.matmul %12, %15, %cst_8 {dimension_numbers = #tpu.dot_dimension_numbers<[2], [2], [1], [1], [0, 0, 0, 1, 1, 1], [0], [0]>} : vector<1x8x8xbf16>, vector<1x8x8xbf16>, vector<1x8x8xf32> -> vector<1x8x8xf32>
    "tpu.trace_stop"() : () -> ()
    %cst_9 = arith.constant dense<0xFF800000> : vector<1x8xf32>
    %20 = vector.multi_reduction <maximumf>, %19, %cst_9 [2] : vector<1x8x8xf32> to vector<1x8xf32>
    %21 = vector.shape_cast %20 : vector<1x8xf32> to vector<1x8x1xf32>
    %22 = vector.broadcast %21 : vector<1x8x1xf32> to vector<1x8x8xf32>
    %23 = arith.subf %19, %22 : vector<1x8x8xf32>
    %24 = math.exp %23 : vector<1x8x8xf32>
    %cst_10 = arith.constant dense<0.000000e+00> : vector<1x8xf32>
    %25 = vector.multi_reduction <add>, %24, %cst_10 [2] : vector<1x8x8xf32> to vector<1x8xf32>
    %26 = vector.shape_cast %25 : vector<1x8xf32> to vector<1x8x1xf32>
    %27 = tpu.reciprocal %26 {approx = true} : vector<1x8x1xf32> -> vector<1x8x1xf32>
    %28 = vector.broadcast %27 : vector<1x8x1xf32> to vector<1x8x8xf32>
    %29 = arith.mulf %24, %28 : vector<1x8x8xf32>
    %30 = arith.truncf %29 : vector<1x8x8xf32> to vector<1x8x8xbf16>
    "tpu.trace_start"() <{level = 10 : i32, message = "bqk,bkd->bqd"}> : () -> ()
    %cst_11 = arith.constant dense<0.000000e+00> : vector<1x8x8xf32>
    %31 = tpu.matmul %30, %18, %cst_11 {dimension_numbers = #tpu.dot_dimension_numbers<[2], [1], [1], [2], [0, 0, 0, 1, 1, 2], [0], [0]>} : vector<1x8x8xbf16>, vector<1x8x8xbf16>, vector<1x8x8xf32> -> vector<1x8x8xf32>
    "tpu.trace_stop"() : () -> ()
    %32 = vector.shape_cast %31 : vector<1x8x8xf32> to vector<8x8xf32>
    %c0_12 = arith.constant 0 : index
    %c0_13 = arith.constant 0 : index
    %c0_14 = arith.constant 0 : index
    %33 = vector.load %arg5[%c0_12, %c0_13, %c0_14] : memref<1x8x8xf32, #tpu.memory_space<vmem>>, vector<1x8x8xf32>
    %34 = vector.shape_cast %33 : vector<1x8x8xf32> to vector<8x8xf32>
    %35 = vector.shape_cast %32 : vector<8x8xf32> to vector<1x8x8xf32>
    tpu.vector_store %arg5[%c0_12, %c0_13, %c0_14], %35 {strides = array<i32>} : memref<1x8x8xf32, #tpu.memory_space<vmem>>, vector<1x8x8xf32>,
    return
  }
  func.func @transform_0(%arg0: i32, %arg1: i32) -> (i32, i32) {
    %c0_i32 = arith.constant 0 : i32
    %c0_i32_0 = arith.constant 0 : i32
    return %arg0, %c0_i32 : i32, i32
  }
  func.func @transform_1(%arg0: i32, %arg1: i32) -> (i32, i32, i32) {
    %c0_i32 = arith.constant 0 : i32
    %c0_i32_0 = arith.constant 0 : i32
    %c0_i32_1 = arith.constant 0 : i32
    return %arg1, %c0_i32, %c0_i32_0 : i32, i32, i32
  }
  func.func @transform_2(%arg0: i32, %arg1: i32) -> (i32, i32, i32) {
    %c0_i32 = arith.constant 0 : i32
    %c0_i32_0 = arith.constant 0 : i32
    %c0_i32_1 = arith.constant 0 : i32
    return %arg1, %c0_i32, %c0_i32_0 : i32, i32, i32
  }
  func.func @transform_3(%arg0: i32, %arg1: i32) -> (i32, i32, i32) {
    %c0_i32 = arith.constant 0 : i32
    %c0_i32_0 = arith.constant 0 : i32
    return %arg1, %arg0, %c0_i32 : i32, i32, i32
  }
}

</mosaic_0001>

<bundles_post_ra>
// kernel: tpu_custom_call.1
= control target key start
LH: loop header
LB: loop body
LE: loop exit
PB: predicated region body
PF: predicated region fallthrough
CT: control target
= control target key end

     0   :  { %s667_s12 = smov 0   ;;  %s669_s13 = smov 0   ;;  %s742_s0 = inlined_call_operand.vmem [shape: bf16[16,32], index: 0, kind: input, shape index: {}]   ;;  %s743_s1 = inlined_call_operand.vmem [shape: bf16[4,32,24], index: 1, kind: input, shape index: {}]   ;;  %s744_s2 = inlined_call_operand.vmem [shape: f32[4,1,24], index: 2, kind: input, shape index: {}]   ;;  %s745_s3 = inlined_call_operand.vmem [shape: f32[4,16,8], index: 3, kind: output, shape index: {}]  }
   0x1   :  { %s671_s14 = smov 0   ;;  %s673_s15 = smov 0  }
   0x2   :  { %s675_s16 = smov 0  }
   0x3 LB: > { %s22_s17 = sadd.s32 1, %s633_s14  ;;  %s25_s18 = sadd.s32 1, %s637_s15  ;;  %s641_s16 = sphi %s675_s16, %s13_s16   ;;  %s637_s15 = sphi %s673_s15, %s749_s15   ;;  %s633_s14 = sphi %s671_s14, %s748_s14   ;;  %s629_s13 = sphi %s669_s13, %s747_s13   ;;  %s625_s12 = sphi %s667_s12, %s746_s12  }
   0x4   : > { %p23_p0 = scmp.ge.s32.totalorder %s22_s17, 4  ;;  %p511_p1 = scmp.ge.s32.totalorder %s641_s16, 1 }
   0x5   : > { %p168_p2 = scmp.lt.s32.totalorder %s641_s16, 9 }
   0x6   : > { %s751_s17 = smov (%p23_p0, %s22_s17), 0  ;;  %s753_s18 = smov (!%p23_p0, %s25_s18), %s637_s15 }
   0x7   : > { %p169_p3 = pnand %p511_p1, %p168_p2  ;;  %p27_p4 = scmp.ge.s32.totalorder %s753_s18, 2 }
   0x8   : > { %p206_p5 = scmp.lt.s32.totalorder (!%p169_p3), %s625_s12, 3  ;;  %p202_p6 = scmp.lt.s32.totalorder (!%p169_p3), %s629_s13, 1  ;;  %v643_v0 = vmov (!%p169_p3), 0.0   ;;  %vm644_vm0 = vmmov (!%p169_p3), 0   ;;  %vm247_vm1 = vcmask (!%p169_p3), 261120   ;;  %vm297_vm2 = vcmask (!%p169_p3), 64512  }
   0x9   : > { %s755_s18 = smov (%p27_p4, %s753_s18), 0  ;;  %172 = sbr.rel (%p169_p3) target bundleno = 1109 (0x455), region = 32 }
   0xa   : > { %533 = vmatprep.subr.bf16.mxu0 (!%p169_p3), %v643_v0  ;;  %537 = vmatprep.mubr.msk.bf16.mxu0 (!%p169_p3), %vm644_vm0, %v643_v0  ;;  %s645_s30 = smov (!%p169_p3), 120   ;;  %s646_s4 = smov (!%p169_p3), 112   ;;  %vm361_vm3 = vcmask (!%p169_p3), 1043456  }
   0xb   : > { %541 = vmatprep.subr.bf16.mxu1 (!%p169_p3), %v643_v0  ;;  %543 = vmatprep.mubr.msk.bf16.mxu1 (!%p169_p3), %vm644_vm0, %v643_v0 }
  0x10   : > { %s757_s12 = smov (!%p206_p5, %s625_s12), 3  ;;  %s759_s13 = smov (!%p202_p6, %s629_s13), 1 }
  0x11   : > { %s525_s19 = sshll.u32 %s757_s12, 4  ;;  %s512_s23 = sshll.u32 %s759_s13, 2 }
  0x12   : > { %s210_s22 = scalar_lea.vmem %s743_s1, %s525_s19  ;;  %s205_s26 = scalar_lea.vmem %s742_s0, %s512_s23 }
  0x13   : > { %v597_v1 = vld [vmem:[%s210_s22] sm:$0xff]   ;;  %v598_v2 = vld [vmem:[%s210_s22 + $0x8] sm:$0xff]   ;;  %s213_s29 = scalar_lea.vmem %s744_s2, %s757_s12  ;;  %s515_s5 = sshll.u32 %s757_s12, 1 }
  0x14   : > { %534 = vmatpush3.bf16.msra.mxu0 %v597_v1  ;;  %v223_v3 = vld [vmem:[%s205_s26] sm:$0xf]  ;;  %s219_s6 = sadd.s32 %s515_s5, %s759_s13 }
  0x15   : > { %535 = vmatprep.subr.bf16.mxu0 %v643_v0  ;;  %v517_v4 = vld [vmem:[%s213_s29] ss:$0 sm:$0xff]  ;;  %s516_s7 = sshll.u32 %s219_s6, 3 }
  0x16   : > { %s221_s10 = scalar_lea.vmem %s745_s3, %s516_s7 }
  0x18   : > { %536 = vmatpush3.bf16.msra.mxu0 %v598_v2 }
  0x19   : > { %547 = vmatprep.subr.bf16.mxu0 %v643_v0 }
  0x1b   : > { %538 = vmatmul.mubr.msk.bf16.vlgmr.msra.gmra.mrb[0].mxu0 %vm247_vm1, %v223_v3 }
  0x1c   : > { %549 = vmatprep.mubr.msk.bf16.mxu0 %vm644_vm0, %v643_v0 }
  0xee   : > { %v285_v5 = vpop.f32.mrb[0].mxu0 }
  0xef   : > { %v286_v6 = vadd.f32 %v517_v4, %v285_v5  ;;  %v539_v7 = vpop.f32.mrb[1].mxu0 }
  0xf0   : > { %v288_v8 = vpop.f32.mrb[2].mxu0 }
  0xf1   : > { %v540_v9 = vpop.f32.mrb[3].mxu0  ;;  %v293_v10 = vpack.c.bf16 %v286_v6, %v286_v6  ;;  %v291_v13 = vmul.f32 0.35355338, %v286_v6 }
  0xf3   : > { %295 = vrot.lane.b32.xlu0 %v293_v10, %s645_s30  ;;  %v292_v14 = vpack.c.bf16 %v291_v13, %v291_v13 }
 0x165   : > { %v296_v11 = vpop.permute.xlu0 %295 }
 0x166   : > { %v302_v12 = vsel %vm297_vm2, %v296_v11, 0 }
 0x167   : > { %542 = vmatpush3.bf16.xpose.msra.mxu1 %v302_v12 }
 0x16e   : > { %544 = vmatmul.mubr.msk.bf16.vlgmr.msra.gmra.mrb[0].mxu1 %vm297_vm2, %v292_v14 }
 0x241   : > { %v338_v15 = vpop.f32.mrb[0].mxu1 }
 0x242   : > { %v545_v16 = vpop.f32.mrb[1].mxu1  ;;  %v344_v17 = vsel %vm297_vm2, %v338_v15, -inf }
 0x243   : > { %345 = vmax.xlane.f32.xlu0 %v344_v17  ;;  %v341_v18 = vpop.f32.mrb[2].mxu1 }
 0x244   : > { %v546_v19 = vpop.f32.mrb[3].mxu1 }
 0x2d0   : > { %v346_v20 = vpop.xlane.xlu0 %345 }
 0x2d1   : > { %v347_v21 = vsub.f32 %v338_v15, %v346_v20 }
 0x2d3   : > { %v348_v22 = vmul.f32 1.442695, %v347_v21 }
 0x2d5   : > { %599 = vpow2.f32 %v348_v22 }
 0x2df   : > { %v600_v23 = vpop.eup %599 }
 0x2e0   : > { %v350_v24 = vsel %vm297_vm2, %v600_v23, 0.0 }
 0x2e1   : > { %351 = vadd.xlane.f32.xlu1 %v350_v24 }
 0x2f2   : > { %356 = vrot.lane.b32.xlu1 %v293_v10, %s646_s4 }
 0x36e   : > { %v352_v25 = vpop.xlane.xlu1 %351 }
 0x36f   : > { %601 = vrcp.f32 %v352_v25 }
 0x372   : > { %v357_v26 = vpop.permute.xlu1 %356 }
 0x373   : > { %v363_v27 = vsel %vm361_vm3, %v357_v26, 0 }
 0x374   : > { %548 = vmatpush3.bf16.msra.mxu0 %v363_v27 }
 0x379   : > { %v602_v28 = vpop.eup %601 }
 0x37a   : > { %v354_v29 = vmul.f32 %v602_v28, %v600_v23 }
 0x37c   : > { %v355_v30 = vpack.c.bf16 %v354_v29, %v354_v29 }
 0x37e   : > { %550 = vmatmul.mubr.msk.bf16.vlgmr.msra.gmra.mrb[4].mxu0 %vm297_vm2, %v355_v30 }
 0x451   : > { %v399_v31 = vpop.f32.mrb[4].mxu0 }
 0x452   : > { %405 = vst.msk [vmem:[%s221_s10] sm:$0xff] %vm297_vm2, %v399_v31  ;;  %v551_v32 = vpop.f32.mrb[5].mxu0 }
 0x453   : > { %v402_v33 = vpop.f32.mrb[6].mxu0 }
 0x454   : > { %v552_v34 = vpop.f32.mrb[7].mxu0 }
 0x455 PF: > { %s13_s16 = sadd.s32 1, %s641_s16   ;;  %s746_s12 = smov %s633_s14 }
 0x456   : > { %p10_p7 = scmp.ge.s32.totalorder %s13_s16, 10   ;;  %s747_s13 = smov %s637_s15 }
 0x457   : > { %s748_s14 = smov %s751_s17  ;;  %s749_s15 = smov %s755_s18 }
 0x458   :  { %12 = sbr.rel (!%p10_p7) target bundleno = 3 (0x3), region = 68 }

</bundles_post_ra>
